<compile_context>
chip_gen: v5e
topology: v5e:2x2
jax: 0.10.0
libtpu: 0.0.40
codegen_flags: <defaults>
</compile_context>

<pallas_src>
import jax
import jax.numpy as jnp
from jax.experimental import pallas as pl
from jax.experimental.pallas import tpu as pltpu

TILE_N = 1024          # rows per grid step (sweepable; overhead-amortizing)
HIDDEN = 64
FEAT = 4 * HIDDEN      # 256
PACKED_IN = 8          # iou | prob | cls | reg0..3 | pad


def _uncertainty_kernel(x_ref, w1_ref, b1_ref, w2_ref, b2_ref,
                        wh1_ref, bh1_ref, wh2_ref, bh2_ref, out_ref):
    x = x_ref[...]                # [T, 8]   f32
    w1 = w1_ref[...]              # [8, 256] f32 packed first-layer weights

    # First layers of all four branches (K = 1/1/1/4): VPU broadcast
    # multiply-adds instead of skinny-K MXU matmuls. Column 7 is zero padding.
    h1 = x[:, 0:1] * w1[0:1, :] + b1_ref[...]
    for k in range(1, 7):
        h1 = h1 + x[:, k:k + 1] * w1[k:k + 1, :]
    h1 = jnp.maximum(h1, 0.0)                  # [T, 256] f32

    # Second layers of the four branches as one block-diagonal 256x256 matmul;
    # the result is already the concatenated feature -> no concat / relayout.
    h2 = jnp.dot(h1.astype(jnp.bfloat16), w2_ref[...],
                 preferred_element_type=jnp.float32) + b2_ref[...]
    h2 = jnp.maximum(h2, 0.0)                  # [T, 256] f32

    # Predictor MLP: Linear(256,64) -> ReLU -> Linear(64,2).
    h3 = jnp.dot(h2.astype(jnp.bfloat16), wh1_ref[...],
                 preferred_element_type=jnp.float32) + bh1_ref[...]
    h3 = jnp.maximum(h3, 0.0)                  # [T, 64] f32
    pred = jnp.dot(h3.astype(jnp.bfloat16), wh2_ref[...],
                   preferred_element_type=jnp.float32) + bh2_ref[...]
    out_ref[...] = pred.astype(out_ref.dtype)


def _pack_params(params):
    """Pack per-branch params into the fused kernel weights."""
    (wi1, bi1, wi2, bi2) = params[0]   # iou
    (wp1, bp1, wp2, bp2) = params[1]   # prob
    (wc1, bc1, wc2, bc2) = params[2]   # cls_loss
    (wr1, br1, wr2, br2) = params[3]   # reg_loss
    (wh1, bh1, wh2, bh2) = params[4]   # predictor

    # Packed first layer [8, 256]: row k multiplies packed-input column k.
    w1p = jnp.zeros((PACKED_IN, FEAT), jnp.float32)
    w1p = w1p.at[0, 0:64].set(wi1[0])
    w1p = w1p.at[1, 64:128].set(wp1[0])
    w1p = w1p.at[2, 128:192].set(wc1[0])
    w1p = w1p.at[3:7, 192:256].set(wr1)
    b1p = jnp.concatenate([bi1, bp1, bc1, br1], axis=1)       # [1, 256]

    # Block-diagonal second layer [256, 256].
    w2bd = jnp.zeros((FEAT, FEAT), jnp.float32)
    w2bd = w2bd.at[0:64, 0:64].set(wi2)
    w2bd = w2bd.at[64:128, 64:128].set(wp2)
    w2bd = w2bd.at[128:192, 128:192].set(wc2)
    w2bd = w2bd.at[192:256, 192:256].set(wr2)
    b2p = jnp.concatenate([bi2, bp2, bc2, br2], axis=1)       # [1, 256]

    return (w1p, b1p,
            w2bd.astype(jnp.bfloat16), b2p,
            wh1.astype(jnp.bfloat16), bh1,
            wh2.astype(jnp.bfloat16), bh2)


@jax.jit
def uncertainty_with_loss_feature(ious, probs, cls_loss, reg_loss, params):
    n = ious.shape[0]
    # Pack inputs into one lane-dense [N, 8] array (one DMA stream per tile).
    x = jnp.concatenate(
        [ious.reshape(n, -1).astype(jnp.float32),
         probs.reshape(n, -1).astype(jnp.float32),
         cls_loss.reshape(n, -1).astype(jnp.float32),
         reg_loss.reshape(n, 4).astype(jnp.float32),
         jnp.zeros((n, 1), jnp.float32)], axis=1)             # [n, 8]

    w1p, b1p, w2bd, b2p, wh1, bh1, wh2, bh2 = _pack_params(params)

    # No row padding in the wrapper: partial last block is masked on write.
    tile = min(TILE_N, ((n + 7) // 8) * 8)
    grid = (pl.cdiv(n, tile),)

    def full(shape):
        # Small weight/bias tensors: whole array resident, constant block
        # index -> DMA'd once, reused across all grid steps.
        return pl.BlockSpec(shape, lambda i: (0, 0))

    out = pl.pallas_call(
        _uncertainty_kernel,
        out_shape=jax.ShapeDtypeStruct((n, 2), jnp.float32),
        grid_spec=pltpu.PrefetchScalarGridSpec(
            num_scalar_prefetch=0,
            grid=grid,
            in_specs=[
                pl.BlockSpec((tile, PACKED_IN), lambda i: (i, 0)),
                full(w1p.shape), full(b1p.shape),
                full(w2bd.shape), full(b2p.shape),
                full(wh1.shape), full(bh1.shape),
                full(wh2.shape), full(bh2.shape),
            ],
            out_specs=pl.BlockSpec((tile, 2), lambda i: (i, 0)),
        ),
        compiler_params=pltpu.CompilerParams(
            dimension_semantics=("parallel",),
            vmem_limit_bytes=64 << 20),
    )(x, w1p, b1p, w2bd, b2p, wh1, bh1, wh2, bh2)
    return out


def init_params(key):
    """Deterministic init matching normal_init(mean=0, std=1e-4, bias=0).

    Weights returned already transposed to (in_features, out_features)."""
    std = 1e-4

    def linear(k, fan_in, fan_out):
        w = std * jax.random.normal(k, (fan_in, fan_out), dtype=jnp.float32)
        b = jnp.zeros((1, fan_out), dtype=jnp.float32)
        return w, b

    keys = jax.random.split(key, 10)
    params = []
    for branch_idx, fan_in in enumerate([1, 1, 1, 4]):
        k1, k2 = keys[2 * branch_idx], keys[2 * branch_idx + 1]
        w1, b1 = linear(k1, fan_in, 64)
        w2, b2 = linear(k2, 64, 64)
        params.append((w1, b1, w2, b2))
    wh1, bh1 = linear(keys[8], 64 * 4, 64)
    wh2, bh2 = linear(keys[9], 64, 2)
    params.append((wh1, bh1, wh2, bh2))
    return params


def reference_forward(ious, probs, cls_loss, reg_loss, params):
    """Pure-JAX f32 reference matching the PyTorch module."""
    def branch(x, p):
        w1, b1, w2, b2 = p
        h = jnp.maximum(x @ w1 + b1, 0.0)
        return jnp.maximum(h @ w2 + b2, 0.0)

    feat = jnp.concatenate(
        [branch(ious, params[0]), branch(probs, params[1]),
         branch(cls_loss, params[2]), branch(reg_loss, params[3])], axis=1)
    wh1, bh1, wh2, bh2 = params[4]
    h = jnp.maximum(feat @ wh1 + bh1, 0.0)
    return h @ wh2 + bh2


def _check(n, key):
    k_iou, k_prob, k_cls, k_reg = jax.random.split(key, 4)
    ious = jax.random.uniform(k_iou, (n, 1), dtype=jnp.float32)
    probs = jax.random.uniform(k_prob, (n, 1), dtype=jnp.float32)
    cls_loss = jax.random.uniform(k_cls, (n, 1), dtype=jnp.float32)
    reg_loss = jax.random.uniform(k_reg, (n, 4), dtype=jnp.float32)

    pred = uncertainty_with_loss_feature(ious, probs, cls_loss, reg_loss, PARAMS)
    jax.block_until_ready(pred)
    assert pred.shape == (n, 2), pred.shape

    ref = reference_forward(ious, probs, cls_loss, reg_loss, PARAMS)
    err = float(jnp.max(jnp.abs(pred - ref)))
    scale = float(jnp.max(jnp.abs(ref))) + 1e-30
    # Kernel uses bf16 MXU operands with f32 accumulation, so compare relative
    # to the output scale rather than with a fixed tiny atol.
    assert err <= 0.1 * scale, (n, err, scale)


if __name__ == "__main__":
    key = jax.random.PRNGKey(0)
    k_param, k_small, k_big = jax.random.split(key, 3)

    PARAMS = init_params(k_param)

    # Small batch (grid == 1, whole-array block).
    _check(8, k_small)
    # Partial-last-block path (grid > 1, masked output write).
    _check(1500, k_big)

    print("KERNEL_OK")
</pallas_src>

<mosaic_0001>
module attributes {stable_mosaic.version = 11 : i64} {
  func.func @_uncertainty_kernel(%arg0: i32, %arg1: memref<8x8xf32, #tpu.memory_space<vmem>>, %arg2: memref<8x256xf32, #tpu.memory_space<vmem>>, %arg3: memref<1x256xf32, #tpu.memory_space<vmem>>, %arg4: memref<256x256xbf16, #tpu.memory_space<vmem>>, %arg5: memref<1x256xf32, #tpu.memory_space<vmem>>, %arg6: memref<256x64xbf16, #tpu.memory_space<vmem>>, %arg7: memref<1x64xf32, #tpu.memory_space<vmem>>, %arg8: memref<64x2xbf16, #tpu.memory_space<vmem>>, %arg9: memref<1x2xf32, #tpu.memory_space<vmem>>, %arg10: memref<8x2xf32, #tpu.memory_space<vmem>>) attributes {dimension_semantics = [#tpu.dimension_semantics<parallel>], iteration_bounds = array<i64: 1>, scalar_prefetch = 0 : i64, scratch_operands = 0 : i64, tpu.core_type = #tpu.core_type<tc>, window_params = [{transform_indices = @transform_0, window_bounds = array<i64: 8, 8>}, {pipeline_mode = #tpu.pipeline_mode<synchronous>, transform_indices = @transform_1, window_bounds = array<i64: 8, 256>}, {pipeline_mode = #tpu.pipeline_mode<synchronous>, transform_indices = @transform_2, window_bounds = array<i64: 1, 256>}, {pipeline_mode = #tpu.pipeline_mode<synchronous>, transform_indices = @transform_3, window_bounds = array<i64: 256, 256>}, {pipeline_mode = #tpu.pipeline_mode<synchronous>, transform_indices = @transform_4, window_bounds = array<i64: 1, 256>}, {pipeline_mode = #tpu.pipeline_mode<synchronous>, transform_indices = @transform_5, window_bounds = array<i64: 256, 64>}, {pipeline_mode = #tpu.pipeline_mode<synchronous>, transform_indices = @transform_6, window_bounds = array<i64: 1, 64>}, {pipeline_mode = #tpu.pipeline_mode<synchronous>, transform_indices = @transform_7, window_bounds = array<i64: 64, 2>}, {pipeline_mode = #tpu.pipeline_mode<synchronous>, transform_indices = @transform_8, window_bounds = array<i64: 1, 2>}, {transform_indices = @transform_9, window_bounds = array<i64: 8, 2>}]} {
    %c0 = arith.constant 0 : index
    %c0_0 = arith.constant 0 : index
    %0 = vector.load %arg1[%c0, %c0_0] : memref<8x8xf32, #tpu.memory_space<vmem>>, vector<8x8xf32>
    %c0_1 = arith.constant 0 : index
    %c0_2 = arith.constant 0 : index
    %1 = vector.load %arg2[%c0_1, %c0_2] : memref<8x256xf32, #tpu.memory_space<vmem>>, vector<8x256xf32>
    %2 = vector.extract_strided_slice %0 {offsets = [0, 0], sizes = [8, 1], strides = [1, 1]} : vector<8x8xf32> to vector<8x1xf32>
    %3 = vector.extract_strided_slice %1 {offsets = [0, 0], sizes = [1, 256], strides = [1, 1]} : vector<8x256xf32> to vector<1x256xf32>
    %4 = vector.broadcast %2 : vector<8x1xf32> to vector<8x256xf32>
    %5 = vector.broadcast %3 : vector<1x256xf32> to vector<8x256xf32>
    %6 = arith.mulf %4, %5 : vector<8x256xf32>
    %c0_3 = arith.constant 0 : index
    %c0_4 = arith.constant 0 : index
    %7 = vector.load %arg3[%c0_3, %c0_4] : memref<1x256xf32, #tpu.memory_space<vmem>>, vector<1x256xf32>
    %8 = vector.broadcast %7 : vector<1x256xf32> to vector<8x256xf32>
    %9 = arith.addf %6, %8 : vector<8x256xf32>
    %10 = vector.extract_strided_slice %0 {offsets = [0, 1], sizes = [8, 1], strides = [1, 1]} : vector<8x8xf32> to vector<8x1xf32>
    %11 = vector.extract_strided_slice %1 {offsets = [1, 0], sizes = [1, 256], strides = [1, 1]} : vector<8x256xf32> to vector<1x256xf32>
    %12 = vector.broadcast %10 : vector<8x1xf32> to vector<8x256xf32>
    %13 = vector.broadcast %11 : vector<1x256xf32> to vector<8x256xf32>
    %14 = arith.mulf %12, %13 : vector<8x256xf32>
    %15 = arith.addf %9, %14 : vector<8x256xf32>
    %16 = vector.extract_strided_slice %0 {offsets = [0, 2], sizes = [8, 1], strides = [1, 1]} : vector<8x8xf32> to vector<8x1xf32>
    %17 = vector.extract_strided_slice %1 {offsets = [2, 0], sizes = [1, 256], strides = [1, 1]} : vector<8x256xf32> to vector<1x256xf32>
    %18 = vector.broadcast %16 : vector<8x1xf32> to vector<8x256xf32>
    %19 = vector.broadcast %17 : vector<1x256xf32> to vector<8x256xf32>
    %20 = arith.mulf %18, %19 : vector<8x256xf32>
    %21 = arith.addf %15, %20 : vector<8x256xf32>
    %22 = vector.extract_strided_slice %0 {offsets = [0, 3], sizes = [8, 1], strides = [1, 1]} : vector<8x8xf32> to vector<8x1xf32>
    %23 = vector.extract_strided_slice %1 {offsets = [3, 0], sizes = [1, 256], strides = [1, 1]} : vector<8x256xf32> to vector<1x256xf32>
    %24 = vector.broadcast %22 : vector<8x1xf32> to vector<8x256xf32>
    %25 = vector.broadcast %23 : vector<1x256xf32> to vector<8x256xf32>
    %26 = arith.mulf %24, %25 : vector<8x256xf32>
    %27 = arith.addf %21, %26 : vector<8x256xf32>
    %28 = vector.extract_strided_slice %0 {offsets = [0, 4], sizes = [8, 1], strides = [1, 1]} : vector<8x8xf32> to vector<8x1xf32>
    %29 = vector.extract_strided_slice %1 {offsets = [4, 0], sizes = [1, 256], strides = [1, 1]} : vector<8x256xf32> to vector<1x256xf32>
    %30 = vector.broadcast %28 : vector<8x1xf32> to vector<8x256xf32>
    %31 = vector.broadcast %29 : vector<1x256xf32> to vector<8x256xf32>
    %32 = arith.mulf %30, %31 : vector<8x256xf32>
    %33 = arith.addf %27, %32 : vector<8x256xf32>
    %34 = vector.extract_strided_slice %0 {offsets = [0, 5], sizes = [8, 1], strides = [1, 1]} : vector<8x8xf32> to vector<8x1xf32>
    %35 = vector.extract_strided_slice %1 {offsets = [5, 0], sizes = [1, 256], strides = [1, 1]} : vector<8x256xf32> to vector<1x256xf32>
    %36 = vector.broadcast %34 : vector<8x1xf32> to vector<8x256xf32>
    %37 = vector.broadcast %35 : vector<1x256xf32> to vector<8x256xf32>
    %38 = arith.mulf %36, %37 : vector<8x256xf32>
    %39 = arith.addf %33, %38 : vector<8x256xf32>
    %40 = vector.extract_strided_slice %0 {offsets = [0, 6], sizes = [8, 1], strides = [1, 1]} : vector<8x8xf32> to vector<8x1xf32>
    %41 = vector.extract_strided_slice %1 {offsets = [6, 0], sizes = [1, 256], strides = [1, 1]} : vector<8x256xf32> to vector<1x256xf32>
    %42 = vector.broadcast %40 : vector<8x1xf32> to vector<8x256xf32>
    %43 = vector.broadcast %41 : vector<1x256xf32> to vector<8x256xf32>
    %44 = arith.mulf %42, %43 : vector<8x256xf32>
    %45 = arith.addf %39, %44 : vector<8x256xf32>
    %cst = arith.constant 0.000000e+00 : f32
    %46 = vector.broadcast %cst : f32 to vector<8x256xf32>
    %47 = arith.maximumf %45, %46 : vector<8x256xf32>
    %48 = arith.truncf %47 : vector<8x256xf32> to vector<8x256xbf16>
    %c0_5 = arith.constant 0 : index
    %c0_6 = arith.constant 0 : index
    %49 = vector.load %arg4[%c0_5, %c0_6] : memref<256x256xbf16, #tpu.memory_space<vmem>>, vector<256x256xbf16>
    %cst_7 = arith.constant dense<0.000000e+00> : vector<8x256xf32>
    %50 = tpu.matmul %48, %49, %cst_7 {dimension_numbers = #tpu.dot_dimension_numbers<[1], [0], [0], [1], [0, 0, 1, 1], [], []>} : vector<8x256xbf16>, vector<256x256xbf16>, vector<8x256xf32> -> vector<8x256xf32>
    %c0_8 = arith.constant 0 : index
    %c0_9 = arith.constant 0 : index
    %51 = vector.load %arg5[%c0_8, %c0_9] : memref<1x256xf32, #tpu.memory_space<vmem>>, vector<1x256xf32>
    %52 = vector.broadcast %51 : vector<1x256xf32> to vector<8x256xf32>
    %53 = arith.addf %50, %52 : vector<8x256xf32>
    %cst_10 = arith.constant 0.000000e+00 : f32
    %54 = vector.broadcast %cst_10 : f32 to vector<8x256xf32>
    %55 = arith.maximumf %53, %54 : vector<8x256xf32>
    %56 = arith.truncf %55 : vector<8x256xf32> to vector<8x256xbf16>
    %c0_11 = arith.constant 0 : index
    %c0_12 = arith.constant 0 : index
    %57 = vector.load %arg6[%c0_11, %c0_12] : memref<256x64xbf16, #tpu.memory_space<vmem>>, vector<256x64xbf16>
    %cst_13 = arith.constant dense<0.000000e+00> : vector<8x64xf32>
    %58 = tpu.matmul %56, %57, %cst_13 {dimension_numbers = #tpu.dot_dimension_numbers<[1], [0], [0], [1], [0, 0, 1, 1], [], []>} : vector<8x256xbf16>, vector<256x64xbf16>, vector<8x64xf32> -> vector<8x64xf32>
    %c0_14 = arith.constant 0 : index
    %c0_15 = arith.constant 0 : index
    %59 = vector.load %arg7[%c0_14, %c0_15] : memref<1x64xf32, #tpu.memory_space<vmem>>, vector<1x64xf32>
    %60 = vector.broadcast %59 : vector<1x64xf32> to vector<8x64xf32>
    %61 = arith.addf %58, %60 : vector<8x64xf32>
    %cst_16 = arith.constant 0.000000e+00 : f32
    %62 = vector.broadcast %cst_16 : f32 to vector<8x64xf32>
    %63 = arith.maximumf %61, %62 : vector<8x64xf32>
    %64 = arith.truncf %63 : vector<8x64xf32> to vector<8x64xbf16>
    %c0_17 = arith.constant 0 : index
    %c0_18 = arith.constant 0 : index
    %65 = vector.load %arg8[%c0_17, %c0_18] : memref<64x2xbf16, #tpu.memory_space<vmem>>, vector<64x2xbf16>
    %cst_19 = arith.constant dense<0.000000e+00> : vector<8x2xf32>
    %66 = tpu.matmul %64, %65, %cst_19 {dimension_numbers = #tpu.dot_dimension_numbers<[1], [0], [0], [1], [0, 0, 1, 1], [], []>} : vector<8x64xbf16>, vector<64x2xbf16>, vector<8x2xf32> -> vector<8x2xf32>
    %c0_20 = arith.constant 0 : index
    %c0_21 = arith.constant 0 : index
    %67 = vector.load %arg9[%c0_20, %c0_21] : memref<1x2xf32, #tpu.memory_space<vmem>>, vector<1x2xf32>
    %68 = vector.broadcast %67 : vector<1x2xf32> to vector<8x2xf32>
    %69 = arith.addf %66, %68 : vector<8x2xf32>
    %c0_22 = arith.constant 0 : index
    %c0_23 = arith.constant 0 : index
    %70 = vector.load %arg10[%c0_22, %c0_23] : memref<8x2xf32, #tpu.memory_space<vmem>>, vector<8x2xf32>
    tpu.vector_store %arg10[%c0_22, %c0_23], %69 {strides = array<i32>} : memref<8x2xf32, #tpu.memory_space<vmem>>, vector<8x2xf32>,
    return
  }
  func.func @transform_0(%arg0: i32) -> (i32, i32) {
    %c0_i32 = arith.constant 0 : i32
    %c0_i32_0 = arith.constant 0 : i32
    return %arg0, %c0_i32 : i32, i32
  }
  func.func @transform_1(%arg0: i32) -> (i32, i32) {
    %c0_i32 = arith.constant 0 : i32
    %c0_i32_0 = arith.constant 0 : i32
    %c0_i32_1 = arith.constant 0 : i32
    return %c0_i32, %c0_i32_0 : i32, i32
  }
  func.func @transform_2(%arg0: i32) -> (i32, i32) {
    %c0_i32 = arith.constant 0 : i32
    %c0_i32_0 = arith.constant 0 : i32
    %c0_i32_1 = arith.constant 0 : i32
    return %c0_i32, %c0_i32_0 : i32, i32
  }
  func.func @transform_3(%arg0: i32) -> (i32, i32) {
    %c0_i32 = arith.constant 0 : i32
    %c0_i32_0 = arith.constant 0 : i32
    %c0_i32_1 = arith.constant 0 : i32
    return %c0_i32, %c0_i32_0 : i32, i32
  }
  func.func @transform_4(%arg0: i32) -> (i32, i32) {
    %c0_i32 = arith.constant 0 : i32
    %c0_i32_0 = arith.constant 0 : i32
    %c0_i32_1 = arith.constant 0 : i32
    return %c0_i32, %c0_i32_0 : i32, i32
  }
  func.func @transform_5(%arg0: i32) -> (i32, i32) {
    %c0_i32 = arith.constant 0 : i32
    %c0_i32_0 = arith.constant 0 : i32
    %c0_i32_1 = arith.constant 0 : i32
    return %c0_i32, %c0_i32_0 : i32, i32
  }
  func.func @transform_6(%arg0: i32) -> (i32, i32) {
    %c0_i32 = arith.constant 0 : i32
    %c0_i32_0 = arith.constant 0 : i32
    %c0_i32_1 = arith.constant 0 : i32
    return %c0_i32, %c0_i32_0 : i32, i32
  }
  func.func @transform_7(%arg0: i32) -> (i32, i32) {
    %c0_i32 = arith.constant 0 : i32
    %c0_i32_0 = arith.constant 0 : i32
    %c0_i32_1 = arith.constant 0 : i32
    return %c0_i32, %c0_i32_0 : i32, i32
  }
  func.func @transform_8(%arg0: i32) -> (i32, i32) {
    %c0_i32 = arith.constant 0 : i32
    %c0_i32_0 = arith.constant 0 : i32
    %c0_i32_1 = arith.constant 0 : i32
    return %c0_i32, %c0_i32_0 : i32, i32
  }
  func.func @transform_9(%arg0: i32) -> (i32, i32) {
    %c0_i32 = arith.constant 0 : i32
    %c0_i32_0 = arith.constant 0 : i32
    return %arg0, %c0_i32 : i32, i32
  }
}

</mosaic_0001>

<bundles_post_ra>
// kernel: uncertainty_with_loss_feature.1
= control target key start
LH: loop header
LB: loop body
LE: loop exit
PB: predicated region body
PF: predicated region fallthrough
CT: control target
= control target key end

     0   :  { %v868_v0 = vmov 0   ;;  %v869_v1 = vmov 2   ;;  %v870_v7 = vmov 4   ;;  %v871_v16 = vmov 1   ;;  %s1219_s0 = inlined_call_operand.vmem [shape: f32[8,8], index: 0, kind: input, shape index: {}]   ;;  %s1220_s3 = inlined_call_operand.vmem [shape: bf16[256,256], index: 3, kind: input, shape index: {}]   ;;  %s1221_s5 = inlined_call_operand.vmem [shape: bf16[256,64], index: 5, kind: input, shape index: {}]   ;;  %s1222_s1 = inlined_call_operand.vmem [shape: f32[8,256], index: 1, kind: input, shape index: {}]   ;;  %s1223_s2 = inlined_call_operand.vmem [shape: f32[1,256], index: 2, kind: input, shape index: {}]   ;;  %s1224_s6 = inlined_call_operand.vmem [shape: f32[1,64], index: 6, kind: input, shape index: {}]   ;;  %s1225_s7 = inlined_call_operand.vmem [shape: bf16[64,2], index: 7, kind: input, shape index: {}]   ;;  %s1226_s4 = inlined_call_operand.vmem [shape: f32[1,256], index: 4, kind: input, shape index: {}]   ;;  %s1227_s8 = inlined_call_operand.vmem [shape: f32[1,2], index: 8, kind: input, shape index: {}]   ;;  %s1228_s9 = inlined_call_operand.vmem [shape: f32[8,2], index: 9, kind: output, shape index: {}]  }
   0x1   :  { %858 = vset.pattern.permute.xlu0 %v868_v0  ;;  %860 = vset.pattern.permute.xlu1 %v869_v1  ;;  %v33_v2 = vld [vmem:[%s1219_s0] sm:$0xff]  ;;  %v648_v3 = vld [vmem:[%s1220_s3 + $0x70] sm:$0xf]  ;;  %v814_v4 = vld [vmem:[%s1220_s3 + $0x74] sm:$0xf0]  ;;  %v872_v17 = vmov 3  }
   0x2   :  { %38 = vperm.xlu0 %858, %v33_v2   ;;  %64 = vperm.xlu1 %860, %v33_v2   ;;  %v712_v5 = vld [vmem:[%s1220_s3 + $0xf0] sm:$0xf]  ;;  %v830_v6 = vld [vmem:[%s1220_s3 + $0xf4] sm:$0xf0]  ;;  %v649_v8 = vor.u32 %v814_v4, %v648_v3  ;;  %v813_v10 = vld [vmem:[%s1220_s3 + $0x74] sm:$0xf] }
   0x3   :  { %862 = vset.pattern.permute.xlu2 %v870_v7  ;;  %v713_v9 = vor.u32 %v830_v6, %v712_v5  ;;  %v650_v11 = vld [vmem:[%s1220_s3 + $0x78] sm:$0xf0]  ;;  %v829_v12 = vld [vmem:[%s1220_s3 + $0xf4] sm:$0xf]  ;;  %v873_v18 = vmov 5   ;;  %v874_v19 = vmov 6  }
   0x4   :  { %84 = vperm.xlu2 %862, %v33_v2   ;;  %v653_v13 = vor.u32 %v813_v10, %v650_v11  ;;  %v714_v14 = vld [vmem:[%s1220_s3 + $0xf8] sm:$0xf0]  ;;  %315 = vmatpush.bf16.msra.mxu0 %v649_v8  ;;  %v640_v20 = vld [vmem:[%s1220_s3 + $0x60] sm:$0xf]  ;;  %v812_v21 = vld [vmem:[%s1220_s3 + $0x64] sm:$0xf0] }
   0x5   :  { %328 = vmatpush.bf16.msra.mxu1 %v713_v9  ;;  %v717_v15 = vor.u32 %v829_v12, %v714_v14  ;;  %v704_v22 = vld [vmem:[%s1220_s3 + $0xe0] sm:$0xf]  ;;  %v641_v23 = vor.u32 %v812_v21, %v640_v20  ;;  %v828_v24 = vld [vmem:[%s1220_s3 + $0xe4] sm:$0xf0]  ;;  %v811_v25 = vld [vmem:[%s1220_s3 + $0x64] sm:$0xf] }
   0x6   :  { %341 = vmatpush.bf16.msra.mxu2 %v653_v13  ;;  %v642_v26 = vld [vmem:[%s1220_s3 + $0x68] sm:$0xf0]  ;;  %v705_v27 = vor.u32 %v828_v24, %v704_v22  ;;  %v827_v29 = vld [vmem:[%s1220_s3 + $0xe4] sm:$0xf]  ;;  %v632_v32 = vld [vmem:[%s1220_s3 + $0x50] sm:$0xf] }
   0x7   :  { %354 = vmatpush.bf16.msra.mxu3 %v717_v15  ;;  %v645_v28 = vor.u32 %v811_v25, %v642_v26  ;;  %v706_v30 = vld [vmem:[%s1220_s3 + $0xe8] sm:$0xf0]  ;;  %v810_v33 = vld [vmem:[%s1220_s3 + $0x54] sm:$0xf0]  ;;  %v696_v34 = vld [vmem:[%s1220_s3 + $0xd0] sm:$0xf] }
   0x8   :  { %316 = vmatpush.bf16.msra.mxu0 %v641_v23  ;;  %v709_v31 = vor.u32 %v827_v29, %v706_v30  ;;  %v633_v35 = vor.u32 %v810_v33, %v632_v32  ;;  %v826_v36 = vld [vmem:[%s1220_s3 + $0xd4] sm:$0xf0]  ;;  %v809_v37 = vld [vmem:[%s1220_s3 + $0x54] sm:$0xf]  ;;  %v634_v38 = vld [vmem:[%s1220_s3 + $0x58] sm:$0xf0] }
   0x9   :  { %329 = vmatpush.bf16.msra.mxu1 %v705_v27  ;;  %v697_v39 = vor.u32 %v826_v36, %v696_v34  ;;  %v637_v40 = vor.u32 %v809_v37, %v634_v38  ;;  %v825_v41 = vld [vmem:[%s1220_s3 + $0xd4] sm:$0xf]  ;;  %v698_v42 = vld [vmem:[%s1220_s3 + $0xd8] sm:$0xf0]  ;;  %v624_v44 = vld [vmem:[%s1220_s3 + $0x40] sm:$0xf] }
   0xa   :  { %859 = vset.pattern.permute.xlu0 %v871_v16  ;;  %861 = vset.pattern.permute.xlu1 %v872_v17  ;;  %v701_v43 = vor.u32 %v825_v41, %v698_v42  ;;  %v808_v45 = vld [vmem:[%s1220_s3 + $0x44] sm:$0xf0]  ;;  %v688_v46 = vld [vmem:[%s1220_s3 + $0xc0] sm:$0xf]  ;;  %v807_v49 = vld [vmem:[%s1220_s3 + $0x44] sm:$0xf] }
   0xb   :  { %54 = vperm.xlu0 %859, %v33_v2   ;;  %74 = vperm.xlu1 %861, %v33_v2   ;;  %v625_v47 = vor.u32 %v808_v45, %v624_v44  ;;  %v824_v48 = vld [vmem:[%s1220_s3 + $0xc4] sm:$0xf0]  ;;  %v626_v50 = vld [vmem:[%s1220_s3 + $0x48] sm:$0xf0]  ;;  %v823_v53 = vld [vmem:[%s1220_s3 + $0xc4] sm:$0xf] }
   0xc   :  { %863 = vset.pattern.permute.xlu2 %v873_v18  ;;  %342 = vmatpush.bf16.msra.mxu2 %v645_v28  ;;  %v689_v51 = vor.u32 %v824_v48, %v688_v46  ;;  %v629_v52 = vor.u32 %v807_v49, %v626_v50  ;;  %v690_v54 = vld [vmem:[%s1220_s3 + $0xc8] sm:$0xf0]  ;;  %v616_v56 = vld [vmem:[%s1220_s3 + $0x30] sm:$0xf]  ;;  %v806_v57 = vld [vmem:[%s1220_s3 + $0x34] sm:$0xf0] }
   0xd   :  { %94 = vperm.xlu2 %863, %v33_v2   ;;  %355 = vmatpush.bf16.msra.mxu3 %v709_v31  ;;  %v693_v55 = vor.u32 %v823_v53, %v690_v54  ;;  %v680_v58 = vld [vmem:[%s1220_s3 + $0xb0] sm:$0xf]  ;;  %v617_v59 = vor.u32 %v806_v57, %v616_v56  ;;  %v822_v60 = vld [vmem:[%s1220_s3 + $0xb4] sm:$0xf0]  ;;  %v805_v61 = vld [vmem:[%s1220_s3 + $0x34] sm:$0xf] }
   0xe   :  { %317 = vmatpush.bf16.msra.mxu0 %v633_v35  ;;  %330 = vmatpush.bf16.msra.mxu1 %v697_v39  ;;  %v618_v62 = vld [vmem:[%s1220_s3 + $0x38] sm:$0xf0]  ;;  %v681_v63 = vor.u32 %v822_v60, %v680_v58  ;;  %v821_v1 = vld [vmem:[%s1220_s3 + $0xb4] sm:$0xf]  ;;  %v608_v4 = vld [vmem:[%s1220_s3 + $0x20] sm:$0xf] }
   0xf   :  { %v621_v0 = vor.u32 %v805_v61, %v618_v62  ;;  %v804_v5 = vld [vmem:[%s1220_s3 + $0x24] sm:$0xf0]  ;;  %v672_v6 = vld [vmem:[%s1220_s3 + $0xa0] sm:$0xf]  ;;  %v803_v9 = vld [vmem:[%s1220_s3 + $0x24] sm:$0xf] }
  0x10   :  { %343 = vmatpush.bf16.msra.mxu2 %v637_v40  ;;  %v609_v7 = vor.u32 %v804_v5, %v608_v4  ;;  %v820_v8 = vld [vmem:[%s1220_s3 + $0xa4] sm:$0xf0]  ;;  %v610_v10 = vld [vmem:[%s1220_s3 + $0x28] sm:$0xf0]  ;;  %v819_v13 = vld [vmem:[%s1220_s3 + $0xa4] sm:$0xf] }
  0x11   :  { %356 = vmatpush.bf16.msra.mxu3 %v701_v43  ;;  %v673_v11 = vor.u32 %v820_v8, %v672_v6  ;;  %v613_v12 = vor.u32 %v803_v9, %v610_v10  ;;  %v674_v14 = vld [vmem:[%s1220_s3 + $0xa8] sm:$0xf0]  ;;  %v600_v16 = vld [vmem:[%s1220_s3 + $0x10] sm:$0xf]  ;;  %v802_v17 = vld [vmem:[%s1220_s3 + $0x14] sm:$0xf0] }
  0x12   :  { %318 = vmatpush.bf16.msra.mxu0 %v625_v47  ;;  %331 = vmatpush.bf16.msra.mxu1 %v689_v51  ;;  %v677_v15 = vor.u32 %v819_v13, %v674_v14  ;;  %v601_v18 = vor.u32 %v802_v17, %v600_v16  ;;  %v818_v20 = vld [vmem:[%s1220_s3 + $0x94] sm:$0xf0]  ;;  %v801_v21 = vld [vmem:[%s1220_s3 + $0x14] sm:$0xf]  ;;  %v602_v23 = vld [vmem:[%s1220_s3 + $0x18] sm:$0xf0] }
  0x13   :  { %864 = vset.pattern.permute.xlu1 %v874_v19  ;;  %865 = vset.pattern.permute.xlu0 %v874_v19  ;;  %v664_v19 = vld [vmem:[%s1220_s3 + $0x90] sm:$0xf]  ;;  %v817_v24 = vld [vmem:[%s1220_s3 + $0x94] sm:$0xf]  ;;  %v666_v25 = vld [vmem:[%s1220_s3 + $0x98] sm:$0xf0]  ;;  %v605_v26 = vor.u32 %v801_v21, %v602_v23 }
  0x14   :  { %104 = vperm.xlu1 %864, %v33_v2   ;;  %344 = vmatpush.bf16.msra.mxu2 %v629_v52  ;;  %v682_v2 = vld [vmem:[%s1220_s3 + $0xb8] sm:$0xf0]  ;;  %v665_v22 = vor.u32 %v818_v20, %v664_v19  ;;  %v669_v27 = vor.u32 %v817_v24, %v666_v25  ;;  %v592_v28 = vld [vmem:[%s1220_s3] sm:$0xf]  ;;  %v800_v29 = vld [vmem:[%s1220_s3 + $0x4] sm:$0xf0] }
  0x15   :  { %357 = vmatpush.bf16.msra.mxu3 %v693_v55  ;;  %v685_v3 = vor.u32 %v821_v1, %v682_v2  ;;  %v656_v30 = vld [vmem:[%s1220_s3 + $0x80] sm:$0xf]  ;;  %v593_v31 = vor.u32 %v800_v29, %v592_v28  ;;  %v816_v32 = vld [vmem:[%s1220_s3 + $0x84] sm:$0xf0]  ;;  %v799_v33 = vld [vmem:[%s1220_s3 + $0x4] sm:$0xf] }
  0x16   :  { %319 = vmatpush.bf16.msra.mxu0 %v617_v59  ;;  %332 = vmatpush.bf16.msra.mxu1 %v681_v63  ;;  %v594_v34 = vld [vmem:[%s1220_s3 + $0x8] sm:$0xf0]  ;;  %v657_v35 = vor.u32 %v816_v32, %v656_v30  ;;  %v815_v37 = vld [vmem:[%s1220_s3 + $0x84] sm:$0xf]  ;;  %v838_v40 = vld [vmem:[%s1221_s5 + $0x38] sm:$0xff]  ;;  %vm567_vm0 = vcmask 523264  }
  0x17   :  { %v597_v36 = vor.u32 %v799_v33, %v594_v34  ;;  %v658_v38 = vld [vmem:[%s1220_s3 + $0x88] sm:$0xf0]  ;;  %v846_v41 = vld [vmem:[%s1221_s5 + $0x78] sm:$0xff]  ;;  %v1129_v42 = vld [vmem:[%s1222_s1] sm:$0xff]  ;;  %vm584_vm1 = vcmask 15360  }
  0x18   :  { %345 = vmatpush.bf16.msra.mxu2 %v621_v0  ;;  %v661_v39 = vor.u32 %v815_v37, %v658_v38  ;;  %v1134_v43 = vld [vmem:[%s1222_s1 + $0x8] sm:$0xff]  ;;  %v837_v44 = vld [vmem:[%s1221_s5 + $0x30] sm:$0xff]  ;;  %v41_v48 = vperm.slane %v1129_v42, 0  ;;  %v45_v50 = vld [vmem:[%s1223_s2] sm:$0x3]  ;;  %v57_v58 = vperm.slane %v1129_v42, 1 }
  0x19   :  { %358 = vmatpush.bf16.msra.mxu3 %v685_v3  ;;  %v845_v45 = vld [vmem:[%s1221_s5 + $0x70] sm:$0xff]  ;;  %v42_v49 = vperm.slane %v1134_v43, 0  ;;  %v836_v52 = vld [vmem:[%s1221_s5 + $0x28] sm:$0xff]  ;;  %v47_v54 = vperm.slane %v45_v50, 0  ;;  %v48_v55 = vperm.slane %v45_v50, 1  ;;  %v58_v59 = vperm.slane %v1134_v43, 1 }
  0x1a   :  { %320 = vmatpush.bf16.msra.mxu0 %v609_v7  ;;  %333 = vmatpush.bf16.msra.mxu1 %v673_v11  ;;  %v844_v53 = vld [vmem:[%s1221_s5 + $0x68] sm:$0xff]  ;;  %v835_v60 = vld [vmem:[%s1221_s5 + $0x20] sm:$0xff]  ;;  %v67_v62 = vperm.slane %v1129_v42, 2  ;;  %v68_v63 = vperm.slane %v1134_v43, 2  ;;  %v77_v1 = vperm.slane %v1129_v42, 3  ;;  %v78_v2 = vperm.slane %v1134_v43, 3 }
  0x1b   :  { %v843_v61 = vld [vmem:[%s1221_s5 + $0x60] sm:$0xff]  ;;  %v87_v8 = vperm.slane %v1129_v42, 4  ;;  %v88_v9 = vperm.slane %v1134_v43, 4  ;;  %v97_v10 = vperm.slane %v1129_v42, 5  ;;  %v98_v11 = vperm.slane %v1134_v43, 5  ;;  %v850_v50 = vld [vmem:[%s1225_s7 + $0x18] sm:$0xff] }
  0x1c   :  { %346 = vmatpush.bf16.msra.mxu2 %v613_v12  ;;  %v834_v12 = vld [vmem:[%s1221_s5 + $0x18] sm:$0xff]  ;;  %v107_v24 = vperm.slane %v1129_v42, 6  ;;  %v108_v25 = vperm.slane %v1134_v43, 6 }
  0x1d   :  { %359 = vmatpush.bf16.msra.mxu3 %v677_v15 }
  0x1e   :  { %321 = vmatpush.bf16.msra.mxu0 %v601_v18  ;;  %334 = vmatpush.bf16.msra.mxu1 %v665_v22 }
  0x20   :  { %347 = vmatpush.bf16.msra.mxu2 %v605_v26  ;;  %v833_v26 = vld [vmem:[%s1221_s5 + $0x10] sm:$0xff] }
  0x21   :  { %360 = vmatpush.bf16.msra.mxu3 %v669_v27 }
  0x22   :  { %322 = vmatpush.bf16.msra.mxu0 %v593_v31  ;;  %335 = vmatpush.bf16.msra.mxu1 %v657_v35 }
  0x24   :  { %348 = vmatpush.bf16.msra.mxu2 %v597_v36 }
  0x25   :  { %361 = vmatpush.bf16.msra.mxu3 %v661_v39 }
  0x26   :  { %503 = vmatpush.bf16.msrb.mxu0 %v838_v40  ;;  %516 = vmatpush.bf16.msrb.mxu1 %v846_v41 }
  0x28   :  { %575 = vmatpush.bf16.msrb.mxu2 %v850_v50 }
  0x2a   :  { %504 = vmatpush.bf16.msrb.mxu0 %v837_v44  ;;  %517 = vmatpush.bf16.msrb.mxu1 %v845_v45  ;;  %v842_v44 = vld [vmem:[%s1221_s5 + $0x58] sm:$0xff]  ;;  %v832_v45 = vld [vmem:[%s1221_s5 + $0x8] sm:$0xff] }
  0x2e   :  { %505 = vmatpush.bf16.msrb.mxu0 %v836_v52  ;;  %518 = vmatpush.bf16.msrb.mxu1 %v844_v53 }
  0x32   :  { %506 = vmatpush.bf16.msrb.mxu0 %v835_v60  ;;  %519 = vmatpush.bf16.msrb.mxu1 %v843_v61 }
  0x36   :  { %507 = vmatpush.bf16.msrb.mxu0 %v834_v12  ;;  %520 = vmatpush.bf16.msrb.mxu1 %v842_v44 }
  0x3a   :  { %508 = vmatpush.bf16.msrb.mxu0 %v833_v26 }
  0x3e   :  { %509 = vmatpush.bf16.msrb.mxu0 %v832_v45 }
  0x5e   :  { %v85_v51 = vpop.permute.xlu2 %84 }
  0x5f   :  { %v89_v22 = vmul.f32 %v87_v8, %v85_v51  ;;  %v90_v23 = vmul.f32 %v88_v9, %v85_v51  ;;  %v149_v51 = vld [vmem:[%s1226_s4] sm:$0x3] }
  0x60   :  { %v151_v52 = vperm.slane %v149_v51, 0  ;;  %v847_v8 = vld [vmem:[%s1225_s7] sm:$0xff] }
  0x67   :  { %v95_v17 = vpop.permute.xlu2 %94 }
  0x68   :  { %v99_v29 = vmul.f32 %v97_v10, %v95_v17  ;;  %v100_v30 = vmul.f32 %v98_v11, %v95_v17  ;;  %v866_v10 = vld [vmem:[%s1224_s6] ss:$0 sm:$0xff] }
  0x74   :  { %v39_v46 = vpop.permute.xlu0 %38  ;;  %v65_v47 = vpop.permute.xlu1 %64 }
  0x75   :  { %v43_v56 = vmul.f32 %v41_v48, %v39_v46  ;;  %v44_v57 = vmul.f32 %v42_v49, %v39_v46  ;;  %v69_v13 = vmul.f32 %v67_v62, %v65_v47  ;;  %v70_v14 = vmul.f32 %v68_v63, %v65_v47  ;;  %v841_v46 = vld [vmem:[%s1221_s5 + $0x50] sm:$0xff]  ;;  %v831_v47 = vld [vmem:[%s1221_s5] sm:$0xff]  ;;  %v840_v48 = vld [vmem:[%s1221_s5 + $0x48] sm:$0xff] }
  0x76   :  { %521 = vmatpush.bf16.msrb.mxu1 %v841_v46  ;;  %510 = vmatpush.bf16.msrb.mxu0 %v831_v47  ;;  %v839_v49 = vld [vmem:[%s1221_s5 + $0x40] sm:$0xff] }
  0x77   :  { %v51_v4 = vadd.f32 %v47_v54, %v43_v56  ;;  %v52_v5 = vadd.f32 %v48_v55, %v44_v57  ;;  %v152_v57 = vperm.slane %v149_v51, 1 }
  0x7a   :  { %522 = vmatpush.bf16.msrb.mxu1 %v840_v48 }
  0x7d   :  { %v55_v0 = vpop.permute.xlu0 %54  ;;  %v75_v3 = vpop.permute.xlu1 %74 }
  0x7e   :  { %v59_v6 = vmul.f32 %v57_v58, %v55_v0  ;;  %v60_v7 = vmul.f32 %v58_v59, %v55_v0  ;;  %v79_v20 = vmul.f32 %v77_v1, %v75_v3  ;;  %v80_v21 = vmul.f32 %v78_v2, %v75_v3  ;;  %523 = vmatpush.bf16.msrb.mxu1 %v839_v49 }
  0x80   :  { %v61_v15 = vadd.f32 %v59_v6, %v51_v4  ;;  %v62_v16 = vadd.f32 %v60_v7, %v52_v5  ;;  %v849_v6 = vld [vmem:[%s1225_s7 + $0x10] sm:$0xff]  ;;  %v848_v7 = vld [vmem:[%s1225_s7 + $0x8] sm:$0xff] }
  0x81   :  { %576 = vmatpush.bf16.msrb.mxu2 %v849_v6 }
  0x82   :  { %v71_v18 = vadd.f32 %v69_v13, %v61_v15  ;;  %v72_v19 = vadd.f32 %v70_v14, %v62_v16 }
  0x84   :  { %v81_v27 = vadd.f32 %v79_v20, %v71_v18  ;;  %v82_v28 = vadd.f32 %v80_v21, %v72_v19  ;;  %v867_v18 = vld [vmem:[%s1227_s8] ss:$0 sm:$0xff] }
  0x85   :  { %577 = vmatpush.bf16.msrb.mxu2 %v848_v7 }
  0x86   :  { %v91_v31 = vadd.f32 %v89_v22, %v81_v27  ;;  %v92_v32 = vadd.f32 %v90_v23, %v82_v28  ;;  %v105_v33 = vpop.permute.xlu1 %104 }
  0x87   :  { %v109_v34 = vmul.f32 %v107_v24, %v105_v33  ;;  %v110_v35 = vmul.f32 %v108_v25, %v105_v33 }
  0x88   :  { %v101_v36 = vadd.f32 %v99_v29, %v91_v31  ;;  %v102_v37 = vadd.f32 %v100_v30, %v92_v32 }
  0x89   :  { %578 = vmatpush.bf16.msrb.mxu2 %v847_v8 }
  0x8a   :  { %v111_v38 = vadd.f32 %v109_v34, %v101_v36  ;;  %v112_v39 = vadd.f32 %v110_v35, %v102_v37 }
  0x8c   :  { %v113_v40 = vmax.f32 %v111_v38, 0.0  ;;  %v114_v41 = vmax.f32 %v112_v39, 0.0 }
  0x8e   :  { %v115_v42 = vpack.c.bf16 %v113_v40, %v113_v40  ;;  %v116_v43 = vpack.c.bf16 %v114_v41, %v114_v41 }
  0x90   :  { %323 = vmatmul.bf16.vlgmr.msra.gmra.mxu0 %v115_v42  ;;  %336 = vmatmul.bf16.vlgmr.msra.gmra.mxu1 %v116_v43 }
  0x91   :  { %349 = vmatmul.bf16.vlgmr.msra.gmra.mxu2 %v115_v42  ;;  %362 = vmatmul.bf16.vlgmr.msra.gmra.mxu3 %v116_v43 }
 0x10d   :  { %v324_v53 = vpop.f32.mrf.mxu0  ;;  %v337_v54 = vpop.f32.mrf.mxu1 }
 0x10e   :  { %v325_v55 = vadd.f32 %v324_v53, %v151_v52 }
 0x110   :  { %v338_v56 = vadd.f32 %v337_v54, %v325_v55 }
 0x112   :  { %v367_v58 = vmax.f32 %v338_v56, 0.0 }
 0x114   :  { %v369_v59 = vpack.c.bf16 %v367_v58, %v367_v58  ;;  %v350_v60 = vpop.f32.mrf.mxu2  ;;  %v363_v61 = vpop.f32.mrf.mxu3 }
 0x115   :  { %v351_v62 = vadd.f32 %v350_v60, %v152_v57  ;;  %v326_v63 = vpop.f32.mrf.mxu0  ;;  %v339_v0 = vpop.f32.mrf.mxu1 }
 0x116   :  { %511 = vmatmul.bf16.vlgmr.msrb.gmra.mxu0 %v369_v59 }
 0x117   :  { %v364_v1 = vadd.f32 %v363_v61, %v351_v62 }
 0x119   :  { %v368_v2 = vmax.f32 %v364_v1, 0.0 }
 0x11b   :  { %v370_v3 = vpack.c.bf16 %v368_v2, %v368_v2 }
 0x11c   :  { %v352_v4 = vpop.f32.mrf.mxu2  ;;  %v365_v5 = vpop.f32.mrf.mxu3 }
 0x11d   :  { %524 = vmatmul.bf16.vlgmr.msrb.gmra.mxu1 %v370_v3 }
 0x193   :  { %v512_v9 = vpop.f32.mrf.mxu0 }
 0x194   :  { %v513_v11 = vadd.f32 %v866_v10, %v512_v9 }
 0x19a   :  { %v525_v12 = vpop.f32.mrf.mxu1 }
 0x19b   :  { %v526_v13 = vadd.f32 %v525_v12, %v513_v11  ;;  %v514_v14 = vpop.f32.mrf.mxu0 }
 0x19d   :  { %v529_v15 = vmax.f32 %v526_v13, 0.0 }
 0x19f   :  { %v530_v16 = vpack.c.bf16 %v529_v15, %v529_v15 }
 0x1a1   :  { %798 = vmatmul.msk.bf16.vlgmr.msrb.gmra.mxu2 %vm567_vm0, %v530_v16 }
 0x1a2   :  { %v527_v17 = vpop.f32.mrf.mxu1 }
 0x224   :  { %v580_v19 = vpop.f32.mrf.mxu2 }
 0x225   :  { %v581_v20 = vadd.f32 %v867_v18, %v580_v19 }
 0x227   :  { %585 = vst.msk [vmem:[%s1228_s9] sm:$0xff] %vm584_vm1, %v581_v20 }
 0x22c   :  { %v582_v21 = vpop.f32.mrf.mxu2 }

</bundles_post_ra>
